<compile_context>
chip_gen: v7x
topology: tpu7x:2x2x1
jax: 0.10.0
libtpu: 0.0.40
codegen_flags: <defaults>
</compile_context>

<pallas_src>
from functools import partial

import numpy as np
import jax
import jax.numpy as jnp
from jax.experimental import pallas as pl
from jax.experimental.pallas import tpu as pltpu


# MXU operand / activation storage dtype: bf16 operands with f32 accumulation.
MXU_DTYPE = jnp.bfloat16
ACT_DTYPE = jnp.bfloat16

_SQRT1_2 = 0.7071067811865476

# Scoped VMEM limit: fine on v5e/v6e (128 MiB physical) and within v7x's
# 64 MiB; actual per-step working set at 512x512x1024 bf16 tiles is ~8 MiB.
VMEM_LIMIT_BYTES = 48 * 1024 * 1024


# ----------------------------------------------------------------------------
# small helpers
# ----------------------------------------------------------------------------
def _ceil_to(x, m):
    return ((x + m - 1) // m) * m


def _tile_dim(dim, max_tile, align):
    """Return (padded_dim, tile) with padded_dim % tile == 0, tiling-legal."""
    if dim <= max_tile:
        return dim, dim                       # one block == full dim (always legal)
    tile = max(align, (max_tile // align) * align)
    return _ceil_to(dim, tile), tile


def _erf_approx(x):
    # Abramowitz & Stegun 7.1.26 (max abs err ~1.5e-7) -> effectively exact erf
    # in f32, built only from ops guaranteed to lower in Mosaic.
    p = 0.3275911
    a1, a2, a3, a4, a5 = (0.254829592, -0.284496736, 1.421413741,
                          -1.453152027, 1.061405429)
    ax = jnp.abs(x)
    t = 1.0 / (1.0 + p * ax)
    poly = ((((a5 * t + a4) * t + a3) * t + a2) * t + a1) * t
    y = 1.0 - poly * jnp.exp(-ax * ax)
    return jnp.where(x >= 0.0, y, -y)


def _gelu_erf(x):
    return 0.5 * x * (1.0 + _erf_approx(x * _SQRT1_2))


# ----------------------------------------------------------------------------
# Tiled linear kernel:  y = act(LN?(x) @ w + b) [+ residual]
#   - f32 VMEM accumulator, bf16 MXU operands
#   - optional fused LayerNorm prologue (requires K in a single block)
#   - optional fused GELU epilogue and fused residual add
# ----------------------------------------------------------------------------
def _linear_kernel(*refs, nk, activation, has_residual, has_ln, eps):
    idx = 0
    x_ref = refs[idx]; idx += 1
    w_ref = refs[idx]; idx += 1
    b_ref = refs[idx]; idx += 1
    if has_ln:
        g_ref = refs[idx]; idx += 1
        bt_ref = refs[idx]; idx += 1
    if has_residual:
        r_ref = refs[idx]; idx += 1
    o_ref = refs[idx]
    acc_ref = refs[idx + 1]

    k = pl.program_id(2)

    @pl.when(k == 0)
    def _():
        acc_ref[...] = jnp.zeros_like(acc_ref)

    x = x_ref[...]
    if has_ln:
        # fused LayerNorm prologue (full K row resident: nk == 1 guaranteed)
        xf = x.astype(jnp.float32)
        mu = jnp.mean(xf, axis=-1, keepdims=True)
        var = jnp.mean(jnp.square(xf - mu), axis=-1, keepdims=True)
        xf = (xf - mu) * jax.lax.rsqrt(var + eps)
        x = xf * g_ref[...].astype(jnp.float32) + bt_ref[...].astype(jnp.float32)

    acc_ref[...] += jnp.dot(
        x.astype(MXU_DTYPE),
        w_ref[...].astype(MXU_DTYPE),
        preferred_element_type=jnp.float32)

    @pl.when(k == nk - 1)
    def _():
        y = acc_ref[...] + b_ref[...].astype(jnp.float32)
        if activation == "gelu":
            y = _gelu_erf(y)                           # fused GELU (EUP exp)
        if has_residual:
            y = y + r_ref[...].astype(jnp.float32)     # fused residual add
        o_ref[...] = y.astype(o_ref.dtype)


def pallas_linear(x, w, b, residual=None, activation=None, ln_params=None,
                  bm=512, bn=512, bk=1024):
    """y = activation(LN?(x) @ w + b) (+ residual). x:(M,K), w:(K,N), b:(N,)."""
    M, K = x.shape
    N = w.shape[1]

    # LN fusion needs the full K row in one block; otherwise fall back to a
    # standalone LN pass first.
    if ln_params is not None and K > bk:
        g, bt, eps = ln_params
        x = pallas_layernorm(x, g, bt, eps)
        ln_params = None

    Mp, tm = _tile_dim(M, bm, 8)
    Np, tn = _tile_dim(N, bn, 128)
    Kp, tk = _tile_dim(K, bk, 128)

    xp = x if (Mp == M and Kp == K) else jnp.pad(x, ((0, Mp - M), (0, Kp - K)))
    wp = w if (Kp == K and Np == N) else jnp.pad(w, ((0, Kp - K), (0, Np - N)))
    bp = b if Np == N else jnp.pad(b, (0, Np - N))
    bp = bp.reshape(1, Np).astype(jnp.float32)

    inputs = [xp, wp, bp]
    in_specs = [
        pl.BlockSpec((tm, tk), lambda m, n, k: (m, k)),
        pl.BlockSpec((tk, tn), lambda m, n, k: (k, n)),
        pl.BlockSpec((1, tn), lambda m, n, k: (0, n)),
    ]

    has_ln = ln_params is not None
    eps = 0.0
    if has_ln:
        g, bt, eps = ln_params
        inputs += [g.reshape(1, K).astype(jnp.float32),
                   bt.reshape(1, K).astype(jnp.float32)]
        in_specs += [pl.BlockSpec((1, tk), lambda m, n, k: (0, k)),
                     pl.BlockSpec((1, tk), lambda m, n, k: (0, k))]

    has_residual = residual is not None
    if has_residual:
        rp = residual
        if Mp != M or Np != N:
            rp = jnp.pad(rp, ((0, Mp - M), (0, Np - N)))
        inputs.append(rp)
        in_specs.append(pl.BlockSpec((tm, tn), lambda m, n, k: (m, n)))

    nk = Kp // tk
    out = pl.pallas_call(
        partial(_linear_kernel, nk=nk, activation=activation,
                has_residual=has_residual, has_ln=has_ln, eps=eps),
        out_shape=jax.ShapeDtypeStruct((Mp, Np), x.dtype),
        grid=(Mp // tm, Np // tn, nk),
        in_specs=in_specs,
        out_specs=pl.BlockSpec((tm, tn), lambda m, n, k: (m, n)),
        scratch_shapes=[pltpu.VMEM((tm, tn), jnp.float32)],
        compiler_params=pltpu.CompilerParams(
            dimension_semantics=("parallel", "parallel", "arbitrary"),
            vmem_limit_bytes=VMEM_LIMIT_BYTES),
    )(*inputs)

    if Mp != M or Np != N:
        out = out[:M, :N]
    return out


# ----------------------------------------------------------------------------
# Row-tiled LayerNorm kernel (f32 statistics) — only used where LN cannot be
# fused into a following linear (final encoder norm).
# ----------------------------------------------------------------------------
def _layernorm_kernel(x_ref, g_ref, b_ref, o_ref, *, eps):
    x = x_ref[...].astype(jnp.float32)
    mu = jnp.mean(x, axis=-1, keepdims=True)
    var = jnp.mean(jnp.square(x - mu), axis=-1, keepdims=True)
    xn = (x - mu) * jax.lax.rsqrt(var + eps)
    o_ref[...] = (xn * g_ref[...] + b_ref[...]).astype(o_ref.dtype)


def pallas_layernorm(x, gamma, beta, eps=1e-6, block_rows=1024):
    """LayerNorm over the last dim of x:(M,D), tiled over rows."""
    M, D = x.shape
    Mp, tm = _tile_dim(M, block_rows, 8)
    xp = x if Mp == M else jnp.pad(x, ((0, Mp - M), (0, 0)))
    out = pl.pallas_call(
        partial(_layernorm_kernel, eps=eps),
        out_shape=jax.ShapeDtypeStruct((Mp, D), x.dtype),
        grid=(Mp // tm,),
        in_specs=[
            pl.BlockSpec((tm, D), lambda i: (i, 0)),
            pl.BlockSpec((1, D), lambda i: (0, 0)),
            pl.BlockSpec((1, D), lambda i: (0, 0)),
        ],
        out_specs=pl.BlockSpec((tm, D), lambda i: (i, 0)),
        compiler_params=pltpu.CompilerParams(
            dimension_semantics=("parallel",),
            vmem_limit_bytes=VMEM_LIMIT_BYTES),
    )(xp, gamma.reshape(1, D).astype(jnp.float32),
      beta.reshape(1, D).astype(jnp.float32))
    return out[:M] if Mp != M else out


# ----------------------------------------------------------------------------
# Attention kernel: grid=(B, H), head-major (B,H,L,Dh) q/k/v blocks (lane-dense
# DMAs, no in-kernel lane slicing), per-head direct store, scale folded into q,
# in-kernel key-mask bias, approx reciprocal softmax.
# Assumption (same as before): attn_mask is a key mask -> additive -1e9 bias.
# ----------------------------------------------------------------------------
def _attn_kernel(q_ref, k_ref, v_ref, *rest, scale, use_mask):
    if use_mask:
        mask_ref, o_ref = rest
        bias = (mask_ref[0].astype(jnp.float32) - 1.0) * 1e9        # (1, L)
    else:
        (o_ref,) = rest
        bias = None

    # fold softmax scale into q: L*Dh multiplies instead of L*L on the scores
    q = (q_ref[...] * scale).astype(MXU_DTYPE)                      # (L, Dh)
    k = k_ref[...].astype(MXU_DTYPE)                                # (L, Dh)
    v = v_ref[...].astype(MXU_DTYPE)                                # (L, Dh)

    s = jax.lax.dot_general(q, k, (((1,), (1,)), ((), ())),
                            preferred_element_type=jnp.float32)     # (L, L)
    if bias is not None:
        s = s + bias
    s = s - jnp.max(s, axis=-1, keepdims=True)
    e = jnp.exp(s)
    p = e * pl.reciprocal(jnp.sum(e, axis=-1, keepdims=True), approx=True)
    o_ref[...] = jnp.dot(p.astype(MXU_DTYPE), v,
                         preferred_element_type=jnp.float32).astype(o_ref.dtype)


def pallas_attention(qkv, key_mask, num_heads):
    """qkv:(B,L,3D) fused layout; key_mask:(B,L) key mask (1=keep) or None."""
    B, L, threeD = qkv.shape
    D = threeD // 3
    Dh = D // num_heads
    scale = Dh ** -0.5

    # Head-major layout so each (b, h) grid step DMAs lane-dense (L, Dh) tiles.
    # (Pure layout plumbing done once by XLA; removes all in-kernel relayouts.)
    qkv5 = qkv.reshape(B, L, 3, num_heads, Dh)
    q = jnp.transpose(qkv5[:, :, 0], (0, 2, 1, 3))                  # (B,H,L,Dh)
    k = jnp.transpose(qkv5[:, :, 1], (0, 2, 1, 3))
    v = jnp.transpose(qkv5[:, :, 2], (0, 2, 1, 3))

    use_mask = key_mask is not None
    qkv_spec = pl.BlockSpec((None, None, L, Dh), lambda b, h: (b, h, 0, 0))
    in_specs = [qkv_spec, qkv_spec, qkv_spec]
    args = [q, k, v]
    if use_mask:
        in_specs.append(pl.BlockSpec((1, 1, L), lambda b, h: (b, 0, 0)))
        args.append(key_mask.reshape(B, 1, L).astype(jnp.float32))

    # TODO(synk): add a key-dimension tile (flash-style online softmax) for
    #             large L so the (L,L) scores stay inside v7x's 64 MiB VMEM.
    out = pl.pallas_call(
        partial(_attn_kernel, scale=scale, use_mask=use_mask),
        out_shape=jax.ShapeDtypeStruct((B, num_heads, L, Dh), qkv.dtype),
        grid=(B, num_heads),
        in_specs=in_specs,
        out_specs=pl.BlockSpec((None, None, L, Dh), lambda b, h: (b, h, 0, 0)),
        compiler_params=pltpu.CompilerParams(
            dimension_semantics=("parallel", "parallel"),
            vmem_limit_bytes=VMEM_LIMIT_BYTES),
    )(*args)

    return jnp.transpose(out, (0, 2, 1, 3)).reshape(B, L, D)


# ----------------------------------------------------------------------------
# Transformer block (timm-style, qkv_bias=True, qk_scale=None)
#   LN1 fused into qkv linear, LN2 fused into fc1; residual adds fused into
#   the proj / fc2 linears' epilogues.
# ----------------------------------------------------------------------------
def block_forward(x, p, attn_mask, num_heads):
    """x:(B,L,D) bf16; attn_mask:(B,L) key mask or None (decoder)."""
    B, L, D = x.shape
    x2d = x.reshape(B * L, D)

    qkv = pallas_linear(x2d, p["qkv_w"], p["qkv_b"],
                        ln_params=(p["ln1_g"], p["ln1_b"], 1e-6))    # (B*L, 3D)
    attn = pallas_attention(qkv.reshape(B, L, 3 * D), attn_mask, num_heads)
    x2d = pallas_linear(attn.reshape(B * L, D), p["proj_w"], p["proj_b"],
                        residual=x2d)

    hidden = pallas_linear(x2d, p["fc1_w"], p["fc1_b"], activation="gelu",
                           ln_params=(p["ln2_g"], p["ln2_b"], 1e-6))
    x2d = pallas_linear(hidden, p["fc2_w"], p["fc2_b"], residual=x2d)
    return x2d.reshape(B, L, D)


# ----------------------------------------------------------------------------
# sincos position embeddings (same as MAE reference)
# ----------------------------------------------------------------------------
def _get_1d_sincos(embed_dim, pos):
    omega = np.arange(embed_dim // 2, dtype=np.float64) / (embed_dim / 2.0)
    omega = 1.0 / 10000 ** omega
    pos = pos.reshape(-1)
    out = np.einsum("m,d->md", pos, omega)
    return np.concatenate([np.sin(out), np.cos(out)], axis=1)


def get_2d_sincos_pos_embed(embed_dim, grid_size, cls_token=False):
    grid_h = np.arange(grid_size, dtype=np.float64)
    grid_w = np.arange(grid_size, dtype=np.float64)
    grid = np.meshgrid(grid_w, grid_h)
    grid = np.stack(grid, axis=0).reshape([2, 1, grid_size, grid_size])
    emb_h = _get_1d_sincos(embed_dim // 2, grid[0])
    emb_w = _get_1d_sincos(embed_dim // 2, grid[1])
    emb = np.concatenate([emb_h, emb_w], axis=1)
    if cls_token:
        emb = np.concatenate([np.zeros([1, embed_dim]), emb], axis=0)
    return emb.astype(np.float32)


# ----------------------------------------------------------------------------
# Parameters (weights / tokens / pos-embeds stored bf16; LN params & biases f32)
# ----------------------------------------------------------------------------
def init_block_params(key, dim, mlp_ratio):
    ks = jax.random.split(key, 4)
    hidden = int(dim * mlp_ratio)
    f32 = jnp.float32
    w = lambda k, s: (jax.random.normal(k, s, f32) * 0.02).astype(MXU_DTYPE)
    return dict(
        ln1_g=jnp.ones((dim,), f32), ln1_b=jnp.zeros((dim,), f32),
        qkv_w=w(ks[0], (dim, 3 * dim)), qkv_b=jnp.zeros((3 * dim,), f32),
        proj_w=w(ks[1], (dim, dim)), proj_b=jnp.zeros((dim,), f32),
        ln2_g=jnp.ones((dim,), f32), ln2_b=jnp.zeros((dim,), f32),
        fc1_w=w(ks[2], (dim, hidden)), fc1_b=jnp.zeros((hidden,), f32),
        fc2_w=w(ks[3], (hidden, dim)), fc2_b=jnp.zeros((dim,), f32),
    )


def init_params(key, cfg):
    p = cfg["patch_size"]
    C = cfg["in_chans"]
    D = cfg["embed_dim"]
    Dd = cfg["decoder_embed_dim"]
    L = (cfg["img_size"] // p) ** 2
    grid = int(L ** 0.5)
    f32 = jnp.float32
    ks = jax.random.split(key, 8 + cfg["depth"] + cfg["decoder_depth"])
    w = lambda k, s: (jax.random.normal(k, s, f32) * 0.02).astype(MXU_DTYPE)

    params = dict(
        patch_w=w(ks[0], (C * p * p, D)),       # Conv2d(D,C,p,p) flattened (c,ph,pw)
        patch_b=jnp.zeros((D,), f32),
        cls_token=w(ks[1], (1, 1, D)),
        mask_enc_token=jnp.zeros((1, D), ACT_DTYPE),
        pos_embed=jnp.asarray(
            get_2d_sincos_pos_embed(D, grid, True))[None].astype(ACT_DTYPE),
        norm_g=jnp.ones((D,), f32), norm_b=jnp.zeros((D,), f32),
        decoder_embed_w=w(ks[2], (D, Dd)),
        decoder_embed_b=jnp.zeros((Dd,), f32),
        mask_token=w(ks[3], (1, Dd)),
        decoder_pos_embed=jnp.asarray(
            get_2d_sincos_pos_embed(Dd, grid, True))[None].astype(ACT_DTYPE),
        dec_norm_g=jnp.ones((Dd,), f32), dec_norm_b=jnp.zeros((Dd,), f32),
        decoder_pred_w=w(ks[4], (Dd, p * p * C)),
        decoder_pred_b=jnp.zeros((p * p * C,), f32),
    )
    params["blocks"] = [
        init_block_params(ks[8 + i], D, cfg["mlp_ratio"])
        for i in range(cfg["depth"])
    ]
    params["decoder_blocks"] = [
        init_block_params(ks[8 + cfg["depth"] + i], Dd, cfg["mlp_ratio"])
        for i in range(cfg["decoder_depth"])
    ]
    return params


# ----------------------------------------------------------------------------
# Masking (data-dependent; host-side NumPy only for index/shape logic, the
# feature gather itself is one vectorized take_along_axis on device).
# The padded keep-length is bucketed (multiple of 8) so distinct mask patterns
# don't force a retrace + Mosaic recompile of every Pallas kernel.
# ----------------------------------------------------------------------------
def masking(x, pix_mask, mask_enc_token, patch, bucket=8):
    N, L, D = x.shape
    m = np.asarray(pix_mask, dtype=np.float32)           # (N,1,H,W), 1 = masked px
    H = m.shape[2]
    h = H // patch
    # F.conv2d with ones kernel, stride=patch  ==  per-patch sum
    m = m.reshape(N, 1, h, patch, h, patch).sum(axis=(3, 5)).reshape(N, h * h)
    m = (m >= patch * patch).astype(np.float32)

    # stable sort: keep indices (ascending) first, then masked indices.
    order = np.argsort(m, axis=1, kind="stable")                   # (N, L)
    ids_restore = np.argsort(order, axis=1, kind="stable")         # inverse perm
    keep_counts = (m == 0).sum(axis=1).astype(np.int32)
    max_len = int(keep_counts.max())
    max_len = min(L, _ceil_to(max(max_len, 1), bucket))            # shape bucket

    gather_idx = order[:, :max_len]                                # (N, max_len)
    attn_mask = (np.arange(max_len)[None, :]
                 < keep_counts[:, None]).astype(np.float32)        # (N, max_len)

    idx = jnp.broadcast_to(jnp.asarray(gather_idx)[:, :, None], (N, max_len, D))
    x_masked = jnp.take_along_axis(x, idx, axis=1)                 # (N, max_len, D)
    keep = jnp.asarray(attn_mask)[:, :, None]
    x_masked = jnp.where(keep > 0, x_masked, mask_enc_token[None, :, :])

    # mask / ids_restore / attn_mask stay host-side NumPy (no device pulls later)
    return x_masked, m, ids_restore, attn_mask


# ----------------------------------------------------------------------------
# Forward
# ----------------------------------------------------------------------------
def unpatchify(x, p, C):
    N, L, _ = x.shape
    h = int(L ** 0.5)
    x = x.reshape(N, h, h, p, p, C)
    x = jnp.transpose(x, (0, 5, 1, 3, 2, 4))      # nhwpqc -> nchpwq
    return x.reshape(N, C, h * p, h * p)


def forward_encoder(params, imgs, pix_mask, cfg):
    p = cfg["patch_size"]
    C = cfg["in_chans"]
    D = cfg["embed_dim"]
    Hheads = cfg["num_heads"]
    N, _, Himg, _ = imgs.shape
    h = Himg // p
    L = h * h

    # patch embed: strided conv == patch-flatten (c,ph,pw) + tiled Pallas matmul
    xp = imgs.reshape(N, C, h, p, h, p)
    xp = jnp.transpose(xp, (0, 2, 4, 1, 3, 5)).reshape(N * L, C * p * p)
    xp = xp.astype(ACT_DTYPE)
    x = pallas_linear(xp, params["patch_w"], params["patch_b"]).reshape(N, L, D)
    x = x + params["pos_embed"][:, 1:, :]

    x, mask, ids_restore, attn_mask = masking(x, pix_mask,
                                              params["mask_enc_token"], p)

    cls = params["cls_token"] + params["pos_embed"][:, :1, :]
    x = jnp.concatenate([jnp.broadcast_to(cls, (N, 1, D)), x], axis=1)
    attn_mask = np.concatenate([np.ones((N, 1), np.float32), attn_mask], axis=1)

    Lx = x.shape[1]
    attn_mask_dev = jnp.asarray(attn_mask)          # (N, Lx) key mask

    for blk in params["blocks"]:
        x = block_forward(x, blk, attn_mask_dev, Hheads)
    x = pallas_layernorm(x.reshape(N * Lx, D),
                         params["norm_g"], params["norm_b"]).reshape(N, Lx, D)
    return x, mask, ids_restore, attn_mask


def forward_decoder(params, x, ids_restore, attn_mask, cfg):
    Dd = cfg["decoder_embed_dim"]
    Hheads = cfg["decoder_num_heads"]
    B, Lx, D = x.shape

    x = pallas_linear(x.reshape(B * Lx, D),
                      params["decoder_embed_w"],
                      params["decoder_embed_b"]).reshape(B, Lx, Dd)

    L = ids_restore.shape[1]
    # mirrors original code: uses attn_mask[0]'s keep count for every sample;
    # attn_mask is a host NumPy array so this is pure host arithmetic (no sync).
    n0 = int((np.asarray(attn_mask)[0] == 1).sum())
    n_mask_tokens = L + 1 - n0
    x_body = x[:, 1:n0, :]                                         # drop cls
    toks = jnp.broadcast_to(params["mask_token"][None], (B, n_mask_tokens, Dd))
    x_ = jnp.concatenate([x_body, toks], axis=1)                   # (B, L, Dd)
    idx = jnp.broadcast_to(jnp.asarray(ids_restore)[:, :, None], (B, L, Dd))
    x_ = jnp.take_along_axis(x_, idx, axis=1)
    x = jnp.concatenate([x[:, :1, :], x_], axis=1)                 # (B, L+1, Dd)
    x = x + params["decoder_pos_embed"]

    Ld = L + 1
    # no attention mask in the decoder -> mask-free attention kernel variant
    for blk in params["decoder_blocks"]:
        x = block_forward(x, blk, None, Hheads)

    # decoder_norm fused into decoder_pred's prologue
    x = pallas_linear(x.reshape(B * Ld, Dd),
                      params["decoder_pred_w"], params["decoder_pred_b"],
                      ln_params=(params["dec_norm_g"], params["dec_norm_b"],
                                 1e-6)).reshape(B, Ld, -1)
    return x[:, 1:, :]


def mae_forward(params, imgs, pix_mask, cfg):
    p = cfg["patch_size"]
    C = cfg["in_chans"]
    latent, mask, ids_restore, attn_mask = forward_encoder(params, imgs,
                                                           pix_mask, cfg)
    pred = forward_decoder(params, latent, ids_restore, attn_mask, cfg)
    image_pred = unpatchify(pred.astype(jnp.float32), p, C)
    mask_rep = jnp.repeat(jnp.asarray(mask)[:, :, None], p * p * C, axis=-1)
    mask_img = unpatchify(mask_rep, p, C)
    return image_pred, mask_img


# ----------------------------------------------------------------------------
if __name__ == "__main__":
    cfg = dict(
        img_size=16, patch_size=4, in_chans=3,
        embed_dim=32, depth=2, num_heads=4,
        decoder_embed_dim=32, decoder_depth=1, decoder_num_heads=4,
        mlp_ratio=4.0, norm_pix_loss=False,
        use_pconv=False, use_random_mask=False,
    )
    key = jax.random.PRNGKey(0)
    params = init_params(key, cfg)

    imgs = jax.random.normal(jax.random.fold_in(key, 123),
                             (2, 3, 16, 16), jnp.float32)

    # Pixel mask (N,1,H,W): 1 = masked pixel. Built from a patch-level pattern.
    patch_mask = np.zeros((2, 16), np.float32)
    patch_mask[0, 10:] = 1.0   # sample 0 keeps 10 patches
    patch_mask[1, 8:] = 1.0    # sample 1 keeps 8 patches (gets mask_enc_token pad)
    pm = patch_mask.reshape(2, 1, 4, 4)
    pix_mask = np.kron(pm, np.ones((1, 1, 4, 4), np.float32))   # (2,1,16,16)

    image_pred, mask_img = mae_forward(params, imgs, pix_mask, cfg)
    image_pred = jax.block_until_ready(image_pred)
    mask_img = jax.block_until_ready(mask_img)

    assert image_pred.shape == (2, 3, 16, 16)
    assert mask_img.shape == (2, 3, 16, 16)
    assert bool(jnp.all(jnp.isfinite(image_pred)))
    assert bool(jnp.all(jnp.isfinite(mask_img)))
    print("KERNEL_OK")
</pallas_src>

<mosaic_0001>
module attributes {stable_mosaic.version = 11 : i64} {
  func.func @_linear_kernel(%arg0: i32, %arg1: i32, %arg2: i32, %arg3: memref<32x48xbf16, #tpu.memory_space<vmem>>, %arg4: memref<48x32xbf16, #tpu.memory_space<vmem>>, %arg5: memref<1x32xf32, #tpu.memory_space<vmem>>, %arg6: memref<32x32xbf16, #tpu.memory_space<vmem>>, %arg7: memref<32x32xf32, #tpu.memory_space<vmem>>) attributes {dimension_semantics = [#tpu.dimension_semantics<parallel>, #tpu.dimension_semantics<parallel>, #tpu.dimension_semantics<arbitrary>], iteration_bounds = array<i64: 1, 1, 1>, scalar_prefetch = 0 : i64, scratch_operands = 1 : i64, tpu.core_type = #tpu.core_type<tc>, window_params = [{transform_indices = @transform_0, window_bounds = array<i64: 32, 48>}, {transform_indices = @transform_1, window_bounds = array<i64: 48, 32>}, {transform_indices = @transform_2, window_bounds = array<i64: 1, 32>}, {transform_indices = @transform_3, window_bounds = array<i64: 32, 32>}]} {
    %c0_i32 = arith.constant 0 : i32
    %0 = arith.cmpi eq, %arg2, %c0_i32 : i32
    %1 = arith.extui %0 : i1 to i32
    %c0_i32_0 = arith.constant 0 : i32
    %2 = arith.cmpi ne, %1, %c0_i32_0 : i32
    scf.if %2 {
      %cst_10 = arith.constant 0.000000e+00 : f32
      %12 = vector.broadcast %cst_10 : f32 to vector<32x32xf32>
      %c0_11 = arith.constant 0 : index
      %c0_12 = arith.constant 0 : index
      %13 = vector.load %arg7[%c0_11, %c0_12] : memref<32x32xf32, #tpu.memory_space<vmem>>, vector<32x32xf32>
      tpu.vector_store %arg7[%c0_11, %c0_12], %12 {strides = array<i32>} : memref<32x32xf32, #tpu.memory_space<vmem>>, vector<32x32xf32>,
    } else {
    }
    %c0 = arith.constant 0 : index
    %c0_1 = arith.constant 0 : index
    %3 = vector.load %arg3[%c0, %c0_1] : memref<32x48xbf16, #tpu.memory_space<vmem>>, vector<32x48xbf16>
    %c0_2 = arith.constant 0 : index
    %c0_3 = arith.constant 0 : index
    %4 = vector.load %arg7[%c0_2, %c0_3] : memref<32x32xf32, #tpu.memory_space<vmem>>, vector<32x32xf32>
    %c0_4 = arith.constant 0 : index
    %c0_5 = arith.constant 0 : index
    %5 = vector.load %arg4[%c0_4, %c0_5] : memref<48x32xbf16, #tpu.memory_space<vmem>>, vector<48x32xbf16>
    %cst = arith.constant dense<0.000000e+00> : vector<32x32xf32>
    %6 = tpu.matmul %3, %5, %cst {dimension_numbers = #tpu.dot_dimension_numbers<[1], [0], [0], [1], [0, 0, 1, 1], [], []>} : vector<32x48xbf16>, vector<48x32xbf16>, vector<32x32xf32> -> vector<32x32xf32>
    %7 = arith.addf %4, %6 : vector<32x32xf32>
    %c0_6 = arith.constant 0 : index
    %c0_7 = arith.constant 0 : index
    %8 = vector.load %arg7[%c0_6, %c0_7] : memref<32x32xf32, #tpu.memory_space<vmem>>, vector<32x32xf32>
    tpu.vector_store %arg7[%c0_6, %c0_7], %7 {strides = array<i32>} : memref<32x32xf32, #tpu.memory_space<vmem>>, vector<32x32xf32>,
    %c0_i32_8 = arith.constant 0 : i32
    %9 = arith.cmpi eq, %arg2, %c0_i32_8 : i32
    %10 = arith.extui %9 : i1 to i32
    %c0_i32_9 = arith.constant 0 : i32
    %11 = arith.cmpi ne, %10, %c0_i32_9 : i32
    scf.if %11 {
      %c0_10 = arith.constant 0 : index
      %c0_11 = arith.constant 0 : index
      %12 = vector.load %arg7[%c0_10, %c0_11] : memref<32x32xf32, #tpu.memory_space<vmem>>, vector<32x32xf32>
      %c0_12 = arith.constant 0 : index
      %c0_13 = arith.constant 0 : index
      %13 = vector.load %arg5[%c0_12, %c0_13] : memref<1x32xf32, #tpu.memory_space<vmem>>, vector<1x32xf32>
      %14 = vector.broadcast %13 : vector<1x32xf32> to vector<32x32xf32>
      %15 = arith.addf %12, %14 : vector<32x32xf32>
      %16 = arith.truncf %15 : vector<32x32xf32> to vector<32x32xbf16>
      %c0_14 = arith.constant 0 : index
      %c0_15 = arith.constant 0 : index
      %17 = vector.load %arg6[%c0_14, %c0_15] : memref<32x32xbf16, #tpu.memory_space<vmem>>, vector<32x32xbf16>
      tpu.vector_store %arg6[%c0_14, %c0_15], %16 {strides = array<i32>} : memref<32x32xbf16, #tpu.memory_space<vmem>>, vector<32x32xbf16>,
    } else {
    }
    return
  }
  func.func @transform_0(%arg0: i32, %arg1: i32, %arg2: i32) -> (i32, i32) {
    %c0_i32 = arith.constant 0 : i32
    return %arg0, %arg2 : i32, i32
  }
  func.func @transform_1(%arg0: i32, %arg1: i32, %arg2: i32) -> (i32, i32) {
    %c0_i32 = arith.constant 0 : i32
    return %arg2, %arg1 : i32, i32
  }
  func.func @transform_2(%arg0: i32, %arg1: i32, %arg2: i32) -> (i32, i32) {
    %c0_i32 = arith.constant 0 : i32
    %c0_i32_0 = arith.constant 0 : i32
    return %c0_i32, %arg1 : i32, i32
  }
  func.func @transform_3(%arg0: i32, %arg1: i32, %arg2: i32) -> (i32, i32) {
    %c0_i32 = arith.constant 0 : i32
    return %arg0, %arg1 : i32, i32
  }
}

</mosaic_0001>

<bundles_post_ra>
// kernel: tpu_custom_call.1
= control target key start
LH: loop header
LB: loop body
LE: loop exit
PB: predicated region body
PF: predicated region fallthrough
CT: control target
= control target key end

     0   :  { %vm20_vm0 = vcmask 261120   ;;  %vm67_vm1 = vcmask 392192   ;;  %v251_v3 = vmov 0.0   ;;  %s315_s0 = inlined_call_operand.vmem [shape: bf16[32,48], index: 0, kind: input, shape index: {}]   ;;  %s316_s1 = inlined_call_operand.vmem [shape: bf16[48,32], index: 1, kind: input, shape index: {}]   ;;  %s317_s2 = inlined_call_operand.vmem [shape: f32[1,32], index: 2, kind: input, shape index: {}]   ;;  %s318_s3 = inlined_call_operand.hbm [shape: bf16[32,32], index: 3, kind: output, shape index: {}]  }
   0x1   :  { %v222_v0 = vld [vmem:[%s316_s1] sm:$0xff]   ;;  %v223_v1 = vld [vmem:[%s316_s1 + $0x8] sm:$0xff]   ;;  %23 = vst.msk [vmem:[#allocation2 + $0x10] sm:$0xff] %vm20_vm0, %v251_v3  ;;  %21 = vst.msk [vmem:[#allocation2] sm:$0xff] %vm20_vm0, %v251_v3 }
   0x2   :  { %208 = vmatprep.subr.bf16.mxu0 %v222_v0  ;;  %v225_v2 = vld [vmem:[%s315_s0] sm:$0xff]   ;;  %22 = vst.msk [vmem:[#allocation2 + $0x8] sm:$0xff] %vm20_vm0, %v251_v3  ;;  %24 = vst.msk [vmem:[#allocation2 + $0x18] sm:$0xff] %vm20_vm0, %v251_v3  ;;  %v224_v4 = vld [vmem:[%s316_s1 + $0x10] sm:$0xff]  }
   0x3   :  { %209 = vmatpush3.bf16.msra.mxu0 %v222_v0  ;;  %214 = vmatprep.mubr.msk.bf16.mxu0 %vm67_vm1, %v225_v2 }
   0x4   :  { %210 = vmatprep.subr.bf16.mxu0 %v223_v1 }
   0x5   :  { %8 = vsyncpa [#allocation4], 0  ;;  %v226_v5 = vld [vmem:[%s315_s0 + $0x8] sm:$0xff]   ;;  %v194_v18 = vld [vmem:[%s317_s2] ss:$0 sm:$0xff]  ;;  %vm166_vm2 = vcmask 257024  }
   0x6   :  { %s252_s22 = smov [#allocation3]  }
   0x7   :  { %211 = vmatpush3.bf16.msra.mxu0 %v223_v1  ;;  %s176_s23 = sshll.u32 %s252_s22, 4  ;;  %s177_s23 = int_to_ptr.vmem [resolvable:$true] %s176_s23 }
   0x8   :  { %212 = vmatprep.subr.bf16.mxu0 %v224_v4  ;;  %v31_v6 = vld [vmem:[#allocation2 + $0x10] sm:$0xff]  ;;  %v29_v7 = vld [vmem:[#allocation2] sm:$0xff]  ;;  %s227_s2 = scalar_lea.vmem %s177_s23, 256  ;;  %p232_p1 = scmp.lt.s32.totalorder %s177_s23, %s177_s23 }
   0x9   :  { %v32_v9 = vld [vmem:[#allocation2 + $0x18] sm:$0xff]  ;;  %v30_v12 = vld [vmem:[#allocation2 + $0x8] sm:$0xff]  ;;  %p228_p0 = scmp.ne.s32.totalorder %s177_s23, %s227_s2  ;;  %p233_p2 = scmp.lt.s32.totalorder %s227_s2, %s227_s2 }
   0xb   :  { %213 = vmatpush3.bf16.msra.mxu0 %v224_v4  ;;  %p234_p3 = por %p233_p2, %p232_p1 }
   0xd   :  { %p235_p4 = pnand %p234_p3, %p228_p0 }
   0xe   :  { %215 = vmatmul.mubr.msk.bf16.vlgmr.msra.gmra.mrb[0].mxu0 %vm67_vm1, %v226_v5 }
  0xe1   :  { %v216_v8 = vpop.f32.mrb[0].mxu0 }
  0xe2   :  { %v125_v10 = vadd.f32 %v216_v8, %v31_v6  ;;  %v108_v11 = vpop.f32.mrb[1].mxu0 }
  0xe3   :  { %v123_v13 = vadd.f32 %v108_v11, %v29_v7  ;;  %v217_v14 = vpop.f32.mrb[2].mxu0 }
  0xe4   :  { %130 = vst.msk [vmem:[#allocation2 + $0x10] sm:$0xff] %vm20_vm0, %v125_v10  ;;  %v126_v15 = vadd.f32 %v217_v14, %v32_v9  ;;  %v111_v16 = vpop.f32.mrb[3].mxu0 }
  0xe5   :  { %128 = vst.msk [vmem:[#allocation2] sm:$0xff] %vm20_vm0, %v123_v13  ;;  %v124_v17 = vadd.f32 %v111_v16, %v30_v12 }
  0xe6   :  { %131 = vst.msk [vmem:[#allocation2 + $0x18] sm:$0xff] %vm20_vm0, %v126_v15 }
  0xe7   :  { %129 = vst.msk [vmem:[#allocation2 + $0x8] sm:$0xff] %vm20_vm0, %v124_v17 }
  0xeb   :  { %v137_v19 = vld [vmem:[#allocation2 + $0x10] sm:$0xff] }
  0xec   :  { %v135_v20 = vld [vmem:[#allocation2] sm:$0xff]  ;;  %v148_v21 = vadd.f32 %v194_v18, %v137_v19 }
  0xed   :  { %v138_v22 = vld [vmem:[#allocation2 + $0x18] sm:$0xff]  ;;  %v146_v23 = vadd.f32 %v194_v18, %v135_v20 }
  0xee   :  { %v136_v24 = vld [vmem:[#allocation2 + $0x8] sm:$0xff]  ;;  %v149_v25 = vadd.f32 %v194_v18, %v138_v22  ;;  %v201_v26 = vpack.c.bf16 %v148_v21, %v148_v21 }
  0xef   :  { %v147_v27 = vadd.f32 %v194_v18, %v136_v24  ;;  %v199_v28 = vpack.c.bf16 %v146_v23, %v146_v23 }
  0xf0   :  { %v202_v29 = vpack.c.bf16 %v149_v25, %v149_v25  ;;  %169 = vst.msk [vmem:[#allocation3 + $0x8] sm:$0xf] %vm166_vm2, %v201_v26 }
  0xf1   :  { %v200_v30 = vpack.c.bf16 %v147_v27, %v147_v27  ;;  %167 = vst.msk [vmem:[#allocation3] sm:$0xf] %vm166_vm2, %v199_v28 }
  0xf2   :  { %170 = vst.msk [vmem:[#allocation3 + $0xc] sm:$0xf] %vm166_vm2, %v202_v29 }
  0xf3   :  { %168 = vst.msk [vmem:[#allocation3 + $0x4] sm:$0xf] %vm166_vm2, %v200_v30 }
  0xf4   :  { %238 = shalt.err (!%p235_p4)
}
  0xf5   :  { %s239_s26 = scalar_lea.hbm %s318_s3, 256 }
  0xf6   :  { %p240_p5 = scmp.ne.s32.totalorder %s318_s3, %s239_s26  ;;  %p243_p6 = scmp.lt.u32.totalorder %s239_s26, %s318_s3 }
  0xf8   :  { %p245_p7 = pnand %p243_p6, %p240_p5 }
  0xfa   :  { %248 = shalt.err (!%p245_p7)
}
  0xfb   :  { %s253_s4 = smov 64   ;;  %s254_s5 = smov 4  }
  0xfc   :  { %182 = dma.vmem_to_hbm [thread:$0]  %s177_s23, 256, %s318_s3, [#allocation4], %s253_s4, %s253_s4, %s254_s5  }
  0xfd   :  { %249 = dma.done.wait [#allocation4], 256  }
  0xfe   :  { %250 = vsyncadd [#allocation4], 4294967040 }
  0xff   :  { %186 = vsyncpa [#allocation4], 1 }

</bundles_post_ra>
